<compile_context>
chip_gen: v5e
topology: v5e:2x2
jax: 0.10.0
libtpu: 0.0.40
codegen_flags: <defaults>
</compile_context>

<pallas_src>
import jax
import jax.numpy as jnp
from jax.experimental import pallas as pl
from jax.experimental.pallas import tpu as pltpu


def _round_up(x, m):
    return (x + m - 1) // m * m


def _vmem_budget_and_limit():
    """Generation-aware VMEM sizing.

    v5e/v6e have 128 MiB physical VMEM per TensorCore, v7x has 64 MiB.  The
    streamed, double-buffered tiles are budgeted at half of an explicit
    vmem_limit_bytes that stays well below physical on every generation.
    """
    phys = 64 << 20                                  # conservative: v7x
    try:
        q = int(pltpu.get_tpu_info().vmem_capacity_bytes)
        if q >= (32 << 20):
            phys = q
    except Exception:
        pass
    limit = min(phys * 3 // 4, 96 << 20)
    return limit // 2, limit


def _auto_tile_n(n, f, tb, tile_budget_bytes):
    """Largest lane-aligned N tile whose double-buffered feat+adj tiles fit.

    The (tn, F) bf16 feature tile is lane-padded to 128 lanes in VMEM, so it
    costs tn * max(F,128) * 2 B per buffer; the (tb, tn) bf16 adj tile costs
    tb * tn * 2 B per buffer; both are double-buffered by the pipeline.
    """
    f_lanes = _round_up(f, 128)
    per_row = 4 * (f_lanes + tb)                     # 2 buffers * 2 B * rows
    tn = max(128, (tile_budget_bytes // per_row) // 128 * 128)
    return min(tn, _round_up(n, 128))


# -----------------------------------------------------------------------------
# Kernel: grid = (batch tiles ["parallel"], N-reduction tiles ["arbitrary"]).
# -----------------------------------------------------------------------------
def graphsage_kernel(self_ref, adj_ref, feat_ref, w_self_ref, w_neigh_ref,
                     w_cls_ref, out_ref, neigh_acc, self_part):
    k = pl.program_id(1)

    @pl.when(k == 0)
    def _init():
        neigh_acc[...] = jnp.zeros_like(neigh_acc)
        # Self-feature contribution is invariant over the N reduction: compute
        # it once, off the final (critical) step, overlapping the first DMA.
        self_part[...] = jnp.dot(self_ref[...], w_self_ref[...],
                                 preferred_element_type=jnp.float32)

    # Mean aggregation, partial over this N tile: [tb, tn] @ [tn, F] -> [tb, F]
    neigh_acc[...] += jnp.dot(adj_ref[...], feat_ref[...],
                              preferred_element_type=jnp.float32)

    @pl.when(k == pl.num_programs(1) - 1)
    def _finalize():
        embeds = jnp.maximum(
            self_part[...]
            + jnp.dot(neigh_acc[...].astype(jnp.bfloat16), w_neigh_ref[...],
                      preferred_element_type=jnp.float32),
            0.0)                                                  # [tb, E] f32
        # Classifier, lane-dense padded output: [tb, E] @ [E, c_pad]
        out_ref[...] = jnp.dot(embeds.astype(jnp.bfloat16), w_cls_ref[...],
                               preferred_element_type=jnp.float32)


# -----------------------------------------------------------------------------
# One-time preparation (cast/pad the big tables once, not per forward call).
# -----------------------------------------------------------------------------
def prepare_graphsage(features, w_enc, w_cls, *, tb=256, tn=None):
    """Cast/pad the feature table, split/pad weights, size tiles.  Call once
    per parameter / feature-table version; the forward then only touches the
    small per-batch arrays (self_feats, adj rows)."""
    N, F = features.shape
    E, twoF = w_enc.shape
    C, E2 = w_cls.shape
    assert twoF == 2 * F and E2 == E

    tile_budget, vmem_limit = _vmem_budget_and_limit()
    tb = _round_up(max(tb, 8), 8)          # sublane aligned (multiple of 16 preferred)
    if tn is None:
        tn = _auto_tile_n(N, F, tb, tile_budget)
    tn = min(_round_up(tn, 128), _round_up(N, 128))
    n_pad = _round_up(N, tn)

    feat_b = features.astype(jnp.bfloat16)                      # cached, cast once
    if n_pad != N:
        feat_b = jnp.pad(feat_b, ((0, n_pad - N), (0, 0)))      # zero rows are inert
    # TODO(synk): pack 8 feature rows per 128-lane vreg row (or store (F, N)) to
    # recover the 8x VMEM/lane waste of the lane-sparse (tn, F=16) layout.

    c_pad = _round_up(C, 128)                                   # lane-dense output
    w_self_t = w_enc[:, :F].T.astype(jnp.bfloat16)              # [F, E]
    w_neigh_t = w_enc[:, F:].T.astype(jnp.bfloat16)             # [F, E]
    w_cls_t = jnp.pad(w_cls.T.astype(jnp.bfloat16),
                      ((0, 0), (0, c_pad - C)))                 # [E, c_pad]

    return dict(feat_b=feat_b, w_self_t=w_self_t, w_neigh_t=w_neigh_t,
                w_cls_t=w_cls_t, N=N, n_pad=n_pad, F=F, E=E, C=C, c_pad=c_pad,
                tn=tn, tb=tb, vmem_limit=vmem_limit)


# -----------------------------------------------------------------------------
# Per-call forward.
# -----------------------------------------------------------------------------
def supervised_graphsage_forward(prep, self_feats, adj_norm):
    """Returns scores.t() for a batch of nodes: [B, C]."""
    B, F = self_feats.shape
    N = prep["N"]
    assert F == prep["F"] and adj_norm.shape == (B, N)
    tb, tn, n_pad = prep["tb"], prep["tn"], prep["n_pad"]
    E, c_pad = prep["E"], prep["c_pad"]

    # Per-call casts touch only the small batch arrays (feature table + weights
    # were prepared once).  NOTE: bf16 adj rows round the 1/deg weights by
    # ~0.4% relative; keep adj in f32 upstream if tighter fidelity is needed.
    self_b = self_feats.astype(jnp.bfloat16)
    adj_b = adj_norm.astype(jnp.bfloat16)
    b_pad = _round_up(B, tb)
    if b_pad != B:
        self_b = jnp.pad(self_b, ((0, b_pad - B), (0, 0)))
        adj_b = jnp.pad(adj_b, ((0, b_pad - B), (0, 0)))
    if n_pad != N:
        adj_b = jnp.pad(adj_b, ((0, 0), (0, n_pad - N)))

    grid = (b_pad // tb, n_pad // tn)

    # TODO(synk): for production sparse graphs, replace the dense [B, N] adj
    # stream with scalar-prefetched neighbor index lists + in-kernel row gather.
    out = pl.pallas_call(
        graphsage_kernel,
        out_shape=jax.ShapeDtypeStruct((b_pad, c_pad), jnp.float32),
        grid_spec=pltpu.PrefetchScalarGridSpec(
            num_scalar_prefetch=0,
            grid=grid,
            in_specs=[
                pl.BlockSpec((tb, F), lambda i, k: (i, 0)),      # self feats
                pl.BlockSpec((tb, tn), lambda i, k: (i, k)),     # adj N-tile
                pl.BlockSpec((tn, F), lambda i, k: (k, 0)),      # feature N-tile
                pl.BlockSpec((F, E), lambda i, k: (0, 0)),       # w_enc self half
                pl.BlockSpec((F, E), lambda i, k: (0, 0)),       # w_enc neigh half
                pl.BlockSpec((E, c_pad), lambda i, k: (0, 0)),   # classifier W
            ],
            out_specs=pl.BlockSpec((tb, c_pad), lambda i, k: (i, 0)),
            scratch_shapes=[pltpu.VMEM((tb, F), jnp.float32),    # neigh accum
                            pltpu.VMEM((tb, E), jnp.float32)],   # self part
        ),
        compiler_params=pltpu.CompilerParams(
            dimension_semantics=("parallel", "arbitrary"),
            vmem_limit_bytes=prep["vmem_limit"]),
        # TODO(synk): pipeline_mode=pl.Buffered(1) on the grid-invariant weight
        # specs would reclaim their (never-used) second VMEM buffer.
    )(self_b, adj_b, prep["feat_b"], prep["w_self_t"], prep["w_neigh_t"],
      prep["w_cls_t"])

    return out[:B, :prep["C"]]


def xavier_uniform(key, shape):
    fan_out, fan_in = shape
    bound = jnp.sqrt(6.0 / (fan_in + fan_out))
    return jax.random.uniform(key, shape, jnp.float32, -bound, bound)


if __name__ == "__main__":
    # Small deterministic problem: 512 graph nodes, 16 raw features,
    # embed_dim 32, 7 classes (cora-like head), batch of 32 target nodes.
    N, F, E, C, B = 512, 16, 32, 7, 32
    key = jax.random.PRNGKey(0)
    k_feat, k_adj, k_nodes, k_wenc, k_wcls = jax.random.split(key, 5)

    features = jax.random.normal(k_feat, (N, F), jnp.float32)   # feature table
    nodes = jax.random.randint(k_nodes, (B,), 0, N)             # batch node ids

    # Random binary adjacency rows for the batch; guarantee >=1 neighbor/row.
    adj = (jax.random.uniform(k_adj, (B, N)) < 0.05).astype(jnp.float32)
    adj = adj.at[jnp.arange(B), nodes].set(1.0)
    adj_norm = adj / jnp.sum(adj, axis=1, keepdims=True)        # mean aggregator

    # Parameters (deterministic xavier-uniform, matching module __init__ shapes).
    w_enc = xavier_uniform(k_wenc, (E, 2 * F))   # Encoder.weight  [E, 2F]
    w_cls = xavier_uniform(k_wcls, (C, E))       # SupervisedGraphSage.weight

    # Node-id gather kept in the XLA wrapper (B*F elements; negligible).
    # TODO(synk): fold this gather into the kernel via scalar-prefetched node ids.
    self_feats = jnp.take(features, nodes, axis=0)               # [B, F]

    # --- references ----------------------------------------------------------
    neigh = adj_norm @ features
    combined = jnp.concatenate([self_feats, neigh], axis=1)
    embeds_f32 = jnp.maximum(w_enc @ combined.T, 0.0)            # [E, B]
    scores_f32 = (w_cls @ embeds_f32).T                          # [B, C]

    bf = jnp.bfloat16
    self_p = jnp.dot(self_feats.astype(bf), w_enc[:, :F].T.astype(bf),
                     preferred_element_type=jnp.float32)
    neigh16 = jnp.dot(adj_norm.astype(bf), features.astype(bf),
                      preferred_element_type=jnp.float32)
    neigh_p = jnp.dot(neigh16.astype(bf), w_enc[:, F:].T.astype(bf),
                      preferred_element_type=jnp.float32)
    emb16 = jnp.maximum(self_p + neigh_p, 0.0)
    ref16 = jnp.dot(emb16.astype(bf), w_cls.T.astype(bf),
                    preferred_element_type=jnp.float32)

    # (a) auto-sized tiles: tn covers all of N (grid_n == 1); tb=16 gives two
    #     "parallel" batch tiles (engages the second TensorCore on v7x).
    prep = prepare_graphsage(features, w_enc, w_cls, tb=16)
    out = jax.block_until_ready(
        supervised_graphsage_forward(prep, self_feats, adj_norm))
    assert out.shape == (B, C)
    assert jnp.allclose(out, scores_f32, atol=5e-2, rtol=5e-2)   # vs f32 math
    assert jnp.allclose(out, ref16, atol=5e-3, rtol=5e-3)        # vs bf16 math

    # (b) force tn=128 (grid_n == 4) to exercise the reduction-tiled accumulator
    #     path used at production N.
    prep_small = prepare_graphsage(features, w_enc, w_cls, tb=16, tn=128)
    out2 = jax.block_until_ready(
        supervised_graphsage_forward(prep_small, self_feats, adj_norm))
    assert jnp.allclose(out2, ref16, atol=5e-3, rtol=5e-3)

    print("KERNEL_OK")
</pallas_src>

<mosaic_0001>
module attributes {stable_mosaic.version = 11 : i64} {
  func.func @graphsage_kernel(%arg0: i32, %arg1: i32, %arg2: memref<16x16xbf16, #tpu.memory_space<vmem>>, %arg3: memref<16x512xbf16, #tpu.memory_space<vmem>>, %arg4: memref<512x16xbf16, #tpu.memory_space<vmem>>, %arg5: memref<16x32xbf16, #tpu.memory_space<vmem>>, %arg6: memref<16x32xbf16, #tpu.memory_space<vmem>>, %arg7: memref<32x128xbf16, #tpu.memory_space<vmem>>, %arg8: memref<16x128xf32, #tpu.memory_space<vmem>>, %arg9: memref<16x16xf32, #tpu.memory_space<vmem>>, %arg10: memref<16x32xf32, #tpu.memory_space<vmem>>) attributes {dimension_semantics = [#tpu.dimension_semantics<parallel>, #tpu.dimension_semantics<arbitrary>], iteration_bounds = array<i64: 2, 1>, scalar_prefetch = 0 : i64, scratch_operands = 2 : i64, tpu.core_type = #tpu.core_type<tc>, window_params = [{transform_indices = @transform_0, window_bounds = array<i64: 16, 16>}, {transform_indices = @transform_1, window_bounds = array<i64: 16, 512>}, {transform_indices = @transform_2, window_bounds = array<i64: 512, 16>}, {pipeline_mode = #tpu.pipeline_mode<synchronous>, transform_indices = @transform_3, window_bounds = array<i64: 16, 32>}, {pipeline_mode = #tpu.pipeline_mode<synchronous>, transform_indices = @transform_4, window_bounds = array<i64: 16, 32>}, {pipeline_mode = #tpu.pipeline_mode<synchronous>, transform_indices = @transform_5, window_bounds = array<i64: 32, 128>}, {transform_indices = @transform_6, window_bounds = array<i64: 16, 128>}]} {
    %c0_i32 = arith.constant 0 : i32
    %0 = arith.cmpi eq, %arg1, %c0_i32 : i32
    %1 = arith.extui %0 : i1 to i32
    %c0_i32_0 = arith.constant 0 : i32
    %2 = arith.cmpi ne, %1, %c0_i32_0 : i32
    scf.if %2 {
      %cst_10 = arith.constant 0.000000e+00 : f32
      %12 = vector.broadcast %cst_10 : f32 to vector<16x16xf32>
      %c0_11 = arith.constant 0 : index
      %c0_12 = arith.constant 0 : index
      %13 = vector.load %arg9[%c0_11, %c0_12] : memref<16x16xf32, #tpu.memory_space<vmem>>, vector<16x16xf32>
      tpu.vector_store %arg9[%c0_11, %c0_12], %12 {strides = array<i32>} : memref<16x16xf32, #tpu.memory_space<vmem>>, vector<16x16xf32>,
      %c0_13 = arith.constant 0 : index
      %c0_14 = arith.constant 0 : index
      %14 = vector.load %arg2[%c0_13, %c0_14] : memref<16x16xbf16, #tpu.memory_space<vmem>>, vector<16x16xbf16>
      %c0_15 = arith.constant 0 : index
      %c0_16 = arith.constant 0 : index
      %15 = vector.load %arg5[%c0_15, %c0_16] : memref<16x32xbf16, #tpu.memory_space<vmem>>, vector<16x32xbf16>
      %cst_17 = arith.constant dense<0.000000e+00> : vector<16x32xf32>
      %16 = tpu.matmul %14, %15, %cst_17 {dimension_numbers = #tpu.dot_dimension_numbers<[1], [0], [0], [1], [0, 0, 1, 1], [], []>} : vector<16x16xbf16>, vector<16x32xbf16>, vector<16x32xf32> -> vector<16x32xf32>
      %c0_18 = arith.constant 0 : index
      %c0_19 = arith.constant 0 : index
      %17 = vector.load %arg10[%c0_18, %c0_19] : memref<16x32xf32, #tpu.memory_space<vmem>>, vector<16x32xf32>
      tpu.vector_store %arg10[%c0_18, %c0_19], %16 {strides = array<i32>} : memref<16x32xf32, #tpu.memory_space<vmem>>, vector<16x32xf32>,
    } else {
    }
    %c0 = arith.constant 0 : index
    %c0_1 = arith.constant 0 : index
    %3 = vector.load %arg9[%c0, %c0_1] : memref<16x16xf32, #tpu.memory_space<vmem>>, vector<16x16xf32>
    %c0_2 = arith.constant 0 : index
    %c0_3 = arith.constant 0 : index
    %4 = vector.load %arg3[%c0_2, %c0_3] : memref<16x512xbf16, #tpu.memory_space<vmem>>, vector<16x512xbf16>
    %c0_4 = arith.constant 0 : index
    %c0_5 = arith.constant 0 : index
    %5 = vector.load %arg4[%c0_4, %c0_5] : memref<512x16xbf16, #tpu.memory_space<vmem>>, vector<512x16xbf16>
    %cst = arith.constant dense<0.000000e+00> : vector<16x16xf32>
    %6 = tpu.matmul %4, %5, %cst {dimension_numbers = #tpu.dot_dimension_numbers<[1], [0], [0], [1], [0, 0, 1, 1], [], []>} : vector<16x512xbf16>, vector<512x16xbf16>, vector<16x16xf32> -> vector<16x16xf32>
    %7 = arith.addf %3, %6 : vector<16x16xf32>
    %c0_6 = arith.constant 0 : index
    %c0_7 = arith.constant 0 : index
    %8 = vector.load %arg9[%c0_6, %c0_7] : memref<16x16xf32, #tpu.memory_space<vmem>>, vector<16x16xf32>
    tpu.vector_store %arg9[%c0_6, %c0_7], %7 {strides = array<i32>} : memref<16x16xf32, #tpu.memory_space<vmem>>, vector<16x16xf32>,
    %c0_i32_8 = arith.constant 0 : i32
    %9 = arith.cmpi eq, %arg1, %c0_i32_8 : i32
    %10 = arith.extui %9 : i1 to i32
    %c0_i32_9 = arith.constant 0 : i32
    %11 = arith.cmpi ne, %10, %c0_i32_9 : i32
    scf.if %11 {
      %c0_10 = arith.constant 0 : index
      %c0_11 = arith.constant 0 : index
      %12 = vector.load %arg10[%c0_10, %c0_11] : memref<16x32xf32, #tpu.memory_space<vmem>>, vector<16x32xf32>
      %c0_12 = arith.constant 0 : index
      %c0_13 = arith.constant 0 : index
      %13 = vector.load %arg9[%c0_12, %c0_13] : memref<16x16xf32, #tpu.memory_space<vmem>>, vector<16x16xf32>
      %14 = arith.truncf %13 : vector<16x16xf32> to vector<16x16xbf16>
      %c0_14 = arith.constant 0 : index
      %c0_15 = arith.constant 0 : index
      %15 = vector.load %arg6[%c0_14, %c0_15] : memref<16x32xbf16, #tpu.memory_space<vmem>>, vector<16x32xbf16>
      %cst_16 = arith.constant dense<0.000000e+00> : vector<16x32xf32>
      %16 = tpu.matmul %14, %15, %cst_16 {dimension_numbers = #tpu.dot_dimension_numbers<[1], [0], [0], [1], [0, 0, 1, 1], [], []>} : vector<16x16xbf16>, vector<16x32xbf16>, vector<16x32xf32> -> vector<16x32xf32>
      %17 = arith.addf %12, %16 : vector<16x32xf32>
      %cst_17 = arith.constant 0.000000e+00 : f32
      %18 = vector.broadcast %cst_17 : f32 to vector<16x32xf32>
      %19 = arith.maximumf %17, %18 : vector<16x32xf32>
      %20 = arith.truncf %19 : vector<16x32xf32> to vector<16x32xbf16>
      %c0_18 = arith.constant 0 : index
      %c0_19 = arith.constant 0 : index
      %21 = vector.load %arg7[%c0_18, %c0_19] : memref<32x128xbf16, #tpu.memory_space<vmem>>, vector<32x128xbf16>
      %cst_20 = arith.constant dense<0.000000e+00> : vector<16x128xf32>
      %22 = tpu.matmul %20, %21, %cst_20 {dimension_numbers = #tpu.dot_dimension_numbers<[1], [0], [0], [1], [0, 0, 1, 1], [], []>} : vector<16x32xbf16>, vector<32x128xbf16>, vector<16x128xf32> -> vector<16x128xf32>
      %c0_21 = arith.constant 0 : index
      %c0_22 = arith.constant 0 : index
      %23 = vector.load %arg8[%c0_21, %c0_22] : memref<16x128xf32, #tpu.memory_space<vmem>>, vector<16x128xf32>
      tpu.vector_store %arg8[%c0_21, %c0_22], %22 {strides = array<i32>} : memref<16x128xf32, #tpu.memory_space<vmem>>, vector<16x128xf32>,
    } else {
    }
    return
  }
  func.func @transform_0(%arg0: i32, %arg1: i32) -> (i32, i32) {
    %c0_i32 = arith.constant 0 : i32
    %c0_i32_0 = arith.constant 0 : i32
    return %arg0, %c0_i32 : i32, i32
  }
  func.func @transform_1(%arg0: i32, %arg1: i32) -> (i32, i32) {
    %c0_i32 = arith.constant 0 : i32
    return %arg0, %arg1 : i32, i32
  }
  func.func @transform_2(%arg0: i32, %arg1: i32) -> (i32, i32) {
    %c0_i32 = arith.constant 0 : i32
    %c0_i32_0 = arith.constant 0 : i32
    return %arg1, %c0_i32 : i32, i32
  }
  func.func @transform_3(%arg0: i32, %arg1: i32) -> (i32, i32) {
    %c0_i32 = arith.constant 0 : i32
    %c0_i32_0 = arith.constant 0 : i32
    %c0_i32_1 = arith.constant 0 : i32
    return %c0_i32, %c0_i32_0 : i32, i32
  }
  func.func @transform_4(%arg0: i32, %arg1: i32) -> (i32, i32) {
    %c0_i32 = arith.constant 0 : i32
    %c0_i32_0 = arith.constant 0 : i32
    %c0_i32_1 = arith.constant 0 : i32
    return %c0_i32, %c0_i32_0 : i32, i32
  }
  func.func @transform_5(%arg0: i32, %arg1: i32) -> (i32, i32) {
    %c0_i32 = arith.constant 0 : i32
    %c0_i32_0 = arith.constant 0 : i32
    %c0_i32_1 = arith.constant 0 : i32
    return %c0_i32, %c0_i32_0 : i32, i32
  }
  func.func @transform_6(%arg0: i32, %arg1: i32) -> (i32, i32) {
    %c0_i32 = arith.constant 0 : i32
    %c0_i32_0 = arith.constant 0 : i32
    return %arg0, %c0_i32 : i32, i32
  }
}

</mosaic_0001>

<bundles_post_ra>
// kernel: tpu_custom_call.1
= control target key start
LH: loop header
LB: loop body
LE: loop exit
PB: predicated region body
PF: predicated region fallthrough
CT: control target
= control target key end

     0   :  { %11 = vsyncpa [#allocation5], 0  ;;  %s1530_s0 = inlined_call_operand.vmem [shape: bf16[32,16], index: 0, kind: input, shape index: {}]   ;;  %s1531_s1 = inlined_call_operand.vmem [shape: bf16[32,512], index: 1, kind: input, shape index: {}]   ;;  %s1532_s2 = inlined_call_operand.vmem [shape: bf16[512,16], index: 2, kind: input, shape index: {}]   ;;  %s1533_s3 = inlined_call_operand.vmem [shape: bf16[16,32], index: 3, kind: input, shape index: {}]   ;;  %s1534_s4 = inlined_call_operand.vmem [shape: bf16[16,32], index: 4, kind: input, shape index: {}]   ;;  %s1535_s5 = inlined_call_operand.vmem [shape: bf16[32,128], index: 5, kind: input, shape index: {}]   ;;  %s1536_s6 = inlined_call_operand.hbm [shape: f32[32,128], index: 6, kind: output, shape index: {}]  }
   0x1   :  { %13 = vsyncpa [#allocation5 + $0x1], 0  ;;  %s1310_s21 = smov 0   ;;  %s1312_s22 = smov 0  }
   0x2   :  { %s1314_s23 = smov 0   ;;  %s1316_s24 = smov 0  }
   0x3   :  { %s1318_s25 = smov 0   ;;  %s1320_s26 = smov 0  }
   0x4 LB: > { %s907_s27 = sadd.s32 4294967295, %s1270_s26   ;;  %s908_s28 = sadd.s32 4294967294, %s1270_s26   ;;  %s1270_s26 = sphi %s1320_s26, %s19_s26   ;;  %s1266_s25 = sphi %s1318_s25, %s1543_s25   ;;  %s1262_s24 = sphi %s1316_s24, %s1542_s24   ;;  %s1258_s23 = sphi %s1314_s23, %s1541_s23   ;;  %s1254_s22 = sphi %s1312_s22, %s1540_s22   ;;  %s1250_s21 = sphi %s1310_s21, %s1539_s21  }
   0x5   : > { %s31_s29 = sadd.s32 1, %s1266_s25  ;;  %s181_s30 = sadd.s32 1, %s1258_s23 }
   0x6   : > { %p33_p0 = scmp.ge.s32.totalorder %s31_s29, 2  ;;  %p191_p1 = scmp.ne.s32.totalorder %s1258_s23, %s1254_s22 }
   0x7   : > { %p192_p2 = scmp.eq.s32.totalorder %s907_s27, 1  ;;  %p197_p3 = scmp.ne.s32.totalorder %s1254_s22, %s1250_s21 }
   0x8   : > { %s1545_s29 = smov (%p33_p0, %s31_s29), 0  ;;  %p198_p5 = scmp.eq.s32.totalorder %s908_s28, 1 }
   0x9   : > { %p1350_p4 = por %p192_p2, %p191_p1  ;;  %s178_s8 = ssub.s32 %s1266_s25, %s1545_s29 }
   0xa   : > { %p912_p6 = scmp.ge.s32.totalorder %s1270_s26, 1  ;;  %p179_p7 = scmp.eq.s32.totalorder %s178_s8, 0 }
   0xb   : > { %p1357_p8 = por %p198_p5, %p197_p3  ;;  %p258_p9 = scmp.lt.s32.totalorder %s1270_s26, 3 }
   0xc   : > { %s1363_s10 = scalar_select %p179_p7, %s1258_s23, %s181_s30  }
   0xd   : > { %p259_p10 = pnand %p912_p6, %p258_p9 }
   0xe   : > { %s914_s17 = sshll.u32 (!%p259_p10), %s1262_s24, 1  ;;  %s1133_s13 = sshll.u32 (!%p259_p10), %s1262_s24, 4 }
   0xf   : > { %262 = sbr.rel (%p259_p10) target bundleno = 495 (0x1ef), region = 44  ;;  %p304_p11 = scmp.lt.s32.totalorder (!%p259_p10), %s914_s17, 3 }
  0x10   : > { %s800_s19 = scalar_lea.hbm (!%p259_p10), %s1536_s6, %s1133_s13  ;;  %s1212_s11 = scalar_lea.hbm (!%p259_p10), %s1536_s6, 32 }
  0x14   : > { %v1105_v0 = vld [vmem:[%s1532_s2 + $0x38] sm:$0xff]  ;;  %v1093_v3 = vld [vmem:[%s1533_s3] sm:$0xff]  ;;  %v1104_v5 = vld [vmem:[%s1532_s2 + $0x30] sm:$0xff]  ;;  %s1547_s17 = smov (!%p304_p11, %s914_s17), 3  ;;  %vm333_vm0 = vcmask 130048   ;;  %vm368_vm1 = vcmask 261120  }
  0x15   : > { %v1113_v1 = vld [vmem:[%s1532_s2 + $0x78] sm:$0xff]  ;;  %653 = vmatpush.bf16.msra.mxu1 %v1105_v0  ;;  %v1112_v6 = vld [vmem:[%s1532_s2 + $0x70] sm:$0xff]  ;;  %361 = vmatpush.bf16.msra.mxu0 %v1093_v3  ;;  %s915_s16 = sshll.u32 %s1547_s17, 2  ;;  %v1103_v9 = vld [vmem:[%s1532_s2 + $0x28] sm:$0xff]  ;;  %s1091_s30 = sshll.u32 %s1547_s17, 4  ;;  %v1272_v46 = vmov 0.0  }
  0x16   : > { %v1121_v2 = vld [vmem:[%s1532_s2 + $0xb8] sm:$0xff]  ;;  %667 = vmatpush.bf16.msra.mxu2 %v1113_v1  ;;  %v1120_v7 = vld [vmem:[%s1532_s2 + $0xb0] sm:$0xff]  ;;  %v1111_v10 = vld [vmem:[%s1532_s2 + $0x68] sm:$0xff]  ;;  %s307_s8 = scalar_lea.vmem %s1530_s0, %s915_s16  ;;  %s318_s18 = scalar_lea.vmem %s1531_s1, %s1091_s30  ;;  %334 = vst.msk [vmem:[#allocation2] sm:$0xff] %vm333_vm0, %v1272_v46 }
  0x17   : > { %v1129_v4 = vld [vmem:[%s1532_s2 + $0xf8] sm:$0xff]  ;;  %681 = vmatpush.bf16.msra.mxu3 %v1121_v2  ;;  %v1128_v8 = vld [vmem:[%s1532_s2 + $0xf0] sm:$0xff]  ;;  %v1119_v11 = vld [vmem:[%s1532_s2 + $0xa8] sm:$0xff]  ;;  %335 = vst.msk [vmem:[#allocation2 + $0x8] sm:$0xff] %vm333_vm0, %v1272_v46  ;;  %s300_s30 = sand.u32 1, %s1254_s22  }
  0x18   : > { %v1092_v12 = vld [vmem:[%s307_s8] sm:$0xff]  ;;  %v1127_v13 = vld [vmem:[%s1532_s2 + $0xe8] sm:$0xff]  ;;  %v1101_v18 = vld [vmem:[%s1532_s2 + $0x18] sm:$0xff]  ;;  %s913_s12 = sshll.u32 %s300_s30, 4  ;;  %s789_s20 = scalar_lea.sflag [#allocation5], %s300_s30 }
  0x19   : > { %695 = vmatpush.bf16.msrb.mxu0 %v1129_v4  ;;  %654 = vmatpush.bf16.msra.mxu1 %v1104_v5  ;;  %v1102_v14 = vld [vmem:[%s1532_s2 + $0x20] sm:$0xff]  ;;  %v1109_v19 = vld [vmem:[%s1532_s2 + $0x58] sm:$0xff]  ;;  %v1100_v22 = vld [vmem:[%s1532_s2 + $0x10] sm:$0xff]  ;;  %s302_s14 = scalar_lea.vmem [#allocation4], %s913_s12 }
  0x1a   : > { %668 = vmatpush.bf16.msra.mxu2 %v1112_v6  ;;  %927 = vmatmul.msk.bf16.vlgmr.msra.gmra.mxu0 %vm333_vm0, %v1092_v12  ;;  %v1110_v15 = vld [vmem:[%s1532_s2 + $0x60] sm:$0xff]  ;;  %v1117_v20 = vld [vmem:[%s1532_s2 + $0x98] sm:$0xff]  ;;  %v1108_v23 = vld [vmem:[%s1532_s2 + $0x50] sm:$0xff]  ;;  %s801_s17 = sshll.u32 %s302_s14, 4  ;;  %s802_s17 = int_to_ptr.vmem [resolvable:$true] %s801_s17 }
  0x1b   : > { %682 = vmatpush.bf16.msra.mxu3 %v1120_v7  ;;  %v1118_v16 = vld [vmem:[%s1532_s2 + $0xa0] sm:$0xff]  ;;  %v1125_v21 = vld [vmem:[%s1532_s2 + $0xd8] sm:$0xff]  ;;  %v1116_v24 = vld [vmem:[%s1532_s2 + $0x90] sm:$0xff] }
  0x1c   : > { %v1126_v17 = vld [vmem:[%s1532_s2 + $0xe0] sm:$0xff]  ;;  %v1124_v25 = vld [vmem:[%s1532_s2 + $0xd0] sm:$0xff]  ;;  %v1099_v26 = vld [vmem:[%s1532_s2 + $0x8] sm:$0xff] }
  0x1d   : > { %696 = vmatpush.bf16.msrb.mxu0 %v1128_v8  ;;  %655 = vmatpush.bf16.msra.mxu1 %v1103_v9  ;;  %v1107_v27 = vld [vmem:[%s1532_s2 + $0x48] sm:$0xff]  ;;  %v1098_v30 = vld [vmem:[%s1532_s2] sm:$0xff]  ;;  %v1096_v33 = vld [vmem:[%s318_s18 + $0xc] sm:$0xf0] }
  0x1e   : > { %669 = vmatpush.bf16.msra.mxu2 %v1111_v10  ;;  %v1115_v28 = vld [vmem:[%s1532_s2 + $0x88] sm:$0xff]  ;;  %v1106_v31 = vld [vmem:[%s1532_s2 + $0x40] sm:$0xff]  ;;  %v932_v35 = vld [vmem:[%s318_s18 + $0x10] sm:$0xf0] }
  0x1f   : > { %683 = vmatpush.bf16.msra.mxu3 %v1119_v11  ;;  %v1123_v29 = vld [vmem:[%s1532_s2 + $0xc8] sm:$0xff]  ;;  %v930_v32 = vld [vmem:[%s318_s18] sm:$0xf]  ;;  %v1094_v34 = vld [vmem:[%s318_s18 + $0x4] sm:$0xf] }
  0x20   : > { %v1114_v36 = vld [vmem:[%s1532_s2 + $0x80] sm:$0xff]  ;;  %v938_v37 = vld [vmem:[%s318_s18 + $0x8] sm:$0xf]  ;;  %v1097_v38 = vld [vmem:[%s318_s18 + $0x14] sm:$0xf0]  ;;  %v931_v42 = vor.u32 %v1096_v33, %v930_v32  ;;  %v935_v43 = vor.u32 %v1094_v34, %v932_v35 }
  0x21   : > { %697 = vmatpush.bf16.msrb.mxu0 %v1127_v13  ;;  %656 = vmatpush.bf16.msra.mxu1 %v1102_v14  ;;  %v1122_v39 = vld [vmem:[%s1532_s2 + $0xc0] sm:$0xff]  ;;  %v1095_v40 = vld [vmem:[%s318_s18 + $0xc] sm:$0xf]  ;;  %v940_v41 = vld [vmem:[%s318_s18 + $0x18] sm:$0xf0]  ;;  %v939_v44 = vor.u32 %v1097_v38, %v938_v37  ;;  %s803_s18 = sshll.u32 %s800_s19, 4  ;;  %s804_s18 = int_to_ptr.hbm [resolvable:$true] %s803_s18 }
  0x22   : > { %670 = vmatpush.bf16.msra.mxu2 %v1110_v15  ;;  %v943_v45 = vor.u32 %v1095_v40, %v940_v41  ;;  %v1130_v49 = vld [vmem:[%s1534_s4] sm:$0xff]  ;;  %v1132_v50 = vld [vmem:[%s1535_s5 + $0x8] sm:$0xff]  ;;  %s1206_s27 = sshra.s32 %s804_s18, 4  ;;  %s1207_s27 = int_to_ptr.hbm [resolvable:$true] %s1206_s27 }
  0x23   : > { %684 = vmatpush.bf16.msra.mxu3 %v1118_v16  ;;  %v371_v57 = vld [vmem:[#allocation2] sm:$0xff]  ;;  %v372_v2 = vld [vmem:[#allocation2 + $0x8] sm:$0xff]  ;;  %s1208_s28 = scalar_lea.hbm %s1207_s27, 16  ;;  %p1213_p1 = scmp.lt.s32.totalorder %s1207_s27, %s1536_s6 }
  0x24   : > { %v1131_v8 = vld [vmem:[%s1535_s5] sm:$0xff]  ;;  %p1209_p12 = scmp.ne.s32.totalorder %s1207_s27, %s1208_s28  ;;  %p1214_p2 = scmp.lt.s32.totalorder %s1212_s11, %s1208_s28 }
  0x25   : > { %698 = vmatpush.bf16.msrb.mxu0 %v1126_v17  ;;  %657 = vmatpush.bf16.msra.mxu1 %v1101_v18 }
  0x26   : > { %671 = vmatpush.bf16.msra.mxu2 %v1109_v19  ;;  %p1210_p13 = pnand %p1209_p12, %p1350_p4  ;;  %p1215_p3 = por %p1214_p2, %p1213_p1 }
  0x27   : > { %685 = vmatpush.bf16.msra.mxu3 %v1117_v20 }
  0x28   : > { %p1211_p0 = pneg %p1210_p13 }
  0x29   : > { %699 = vmatpush.bf16.msrb.mxu0 %v1125_v21  ;;  %658 = vmatpush.bf16.msra.mxu1 %v1100_v22 }
  0x2a   : > { %672 = vmatpush.bf16.msra.mxu2 %v1108_v23  ;;  %p1216_p5 = pnand %p1215_p3, %p1211_p0 }
  0x2b   : > { %686 = vmatpush.bf16.msra.mxu3 %v1116_v24 }
  0x2d   : > { %700 = vmatpush.bf16.msrb.mxu0 %v1124_v25  ;;  %659 = vmatpush.bf16.msra.mxu1 %v1099_v26 }
  0x2e   : > { %673 = vmatpush.bf16.msra.mxu2 %v1107_v27 }
  0x2f   : > { %687 = vmatpush.bf16.msra.mxu3 %v1115_v28 }
  0x31   : > { %701 = vmatpush.bf16.msrb.mxu0 %v1123_v29  ;;  %660 = vmatpush.bf16.msra.mxu1 %v1098_v30 }
  0x32   : > { %674 = vmatpush.bf16.msra.mxu2 %v1106_v31 }
  0x33   : > { %688 = vmatpush.bf16.msra.mxu3 %v1114_v36 }
  0x34   : > { %661 = vmatmul.bf16.vlgmr.msra.gmra.mxu1 %v931_v42 }
  0x35   : > { %702 = vmatpush.bf16.msrb.mxu0 %v1122_v39  ;;  %675 = vmatmul.bf16.vlgmr.msra.gmra.mxu2 %v935_v43 }
  0x36   : > { %689 = vmatmul.bf16.vlgmr.msra.gmra.mxu3 %v939_v44  ;;  %740 = vmatpush.bf16.msrb.mxu1 %v1130_v49 }
  0x37   : > { %778 = vmatpush.bf16.msrb.mxu2 %v1132_v50 }
  0x38   : > { %703 = vmatmul.bf16.vlgmr.msrb.gmra.mxu0 %v943_v45 }
  0x3b   : > { %779 = vmatpush.bf16.msrb.mxu2 %v1131_v8 }
  0x97   : > { %v363_v47 = vpop.f32.mrf.mxu0 }
  0x98   : > { %369 = vst.msk [vmem:[#allocation3] sm:$0xff] %vm368_vm1, %v363_v47 }
  0x9f   : > { %v365_v48 = vpop.f32.mrf.mxu0  ;;  %v717_v10 = vld [vmem:[#allocation3] sm:$0xff] }
  0xa0   : > { %370 = vst.msk [vmem:[#allocation3 + $0x8] sm:$0xff] %vm368_vm1, %v365_v48 }
  0xa7   : > { %v718_v12 = vld [vmem:[#allocation3 + $0x8] sm:$0xff] }
  0xb1   : > { %v662_v51 = vpop.f32.mrf.mxu1 }
  0xb5   : > { %v704_v55 = vpop.f32.mrf.mxu0 }
  0xb8   : > { %v676_v52 = vpop.f32.mrf.mxu2 }
  0xb9   : > { %v677_v53 = vadd.f32 %v676_v52, %v662_v51  ;;  %v690_v54 = vpop.f32.mrf.mxu3  ;;  %v664_v60 = vpop.f32.mrf.mxu1 }
  0xbb   : > { %v691_v56 = vadd.f32 %v690_v54, %v677_v53 }
  0xbd   : > { %v705_v58 = vadd.f32 %v704_v55, %v691_v56  ;;  %v706_v1 = vpop.f32.mrf.mxu0 }
  0xbf   : > { %v709_v59 = vadd.f32 %v705_v58, %v371_v57 }
  0xc0   : > { %v678_v61 = vpop.f32.mrf.mxu2 }
  0xc1   : > { %712 = vst.msk [vmem:[#allocation2] sm:$0xff] %vm333_vm0, %v709_v59  ;;  %v679_v62 = vadd.f32 %v678_v61, %v664_v60  ;;  %v692_v63 = vpop.f32.mrf.mxu3 }
  0xc3   : > { %v693_v0 = vadd.f32 %v692_v63, %v679_v62 }
  0xc5   : > { %v707_v3 = vadd.f32 %v706_v1, %v693_v0 }
  0xc7   : > { %v710_v4 = vadd.f32 %v707_v3, %v372_v2 }
  0xc8   : > { %v719_v5 = vld [vmem:[#allocation2] sm:$0xff] }
  0xc9   : > { %713 = vst.msk [vmem:[#allocation2 + $0x8] sm:$0xff] %vm333_vm0, %v710_v4 }
  0xd0   : > { %v720_v6 = vld [vmem:[#allocation2 + $0x8] sm:$0xff] }
  0xd1   : > { %v721_v7 = vpack.c.bf16 %v720_v6, %v719_v5 }
  0xd3   : > { %1076 = vmatmul.msk.bf16.vlgmr.msrb.gmra.mxu1 %vm333_vm0, %v721_v7 }
 0x150   : > { %v742_v9 = vpop.f32.mrf.mxu1 }
 0x151   : > { %v747_v11 = vadd.f32 %v742_v9, %v717_v10 }
 0x153   : > { %v749_v15 = vmax.f32 %v747_v11, 0.0 }
 0x158   : > { %v744_v13 = vpop.f32.mrf.mxu1 }
 0x159   : > { %v748_v14 = vadd.f32 %v744_v13, %v718_v12 }
 0x15b   : > { %v750_v16 = vmax.f32 %v748_v14, 0.0 }
 0x15d   : > { %v751_v17 = vpack.c.bf16 %v750_v16, %v749_v15 }
 0x15f   : > { %1085 = vmatmul.msk.bf16.vlgmr.msrb.gmra.mxu2 %vm368_vm1, %v751_v17 }
 0x1e2   : > { %v781_v18 = vpop.f32.mrf.mxu2 }
 0x1e3   : > { %786 = vst [vmem:[%s302_s14] sm:$0xff] %v781_v18 }
 0x1ea   : > { %v783_v19 = vpop.f32.mrf.mxu2 }
 0x1eb   : > { %787 = vst [vmem:[%s302_s14 + $0x8] sm:$0xff] %v783_v19 }
 0x1ec   : > { %1219 = shalt.err (!%p1216_p5)
}
 0x1ed   : > { %s1273_s30 = smov 128   ;;  %s1274_s14 = smov 8  }
 0x1ee   : > { %1134 = dma.vmem_to_hbm [thread:$0]  (%p1350_p4), %s802_s17, 256, %s804_s18, %s789_s20, %s1273_s30, %s1273_s30, %s1274_s14  }
 0x1ef PF: > { %p1140_p6 = scmp.ge.s32.totalorder %s1270_s26, 2  ;;  %s818_s15 = sand.u32 1, %s1250_s21  }
 0x1f0   : > { %s819_s16 = scalar_lea.sflag [#allocation5], %s818_s15 }
 0x1f1   : > { %p1137_p7 = pnand %p1140_p6, %p1357_p8 }
 0x1f3   : > { %p1138_p9 = pneg %p1137_p7 }
 0x1f5   : > { %1245 = dma.done.wait (%p1138_p9), %s819_s16, 256  }
 0x1f6   : > { %1247 = vsyncadd (%p1138_p9), %s819_s16, 4294967040  ;;  %s19_s26 = sadd.s32 1, %s1270_s26   ;;  %s1539_s21 = smov %s1254_s22 }
 0x1f7   : > { %p16_p10 = scmp.ge.s32.totalorder %s19_s26, 4   ;;  %s1540_s22 = smov %s1258_s23 }
 0x1f8   : > { %s1541_s23 = smov %s1363_s10  ;;  %s1542_s24 = smov %s1266_s25 }
 0x1f9   : > { %s1543_s25 = smov %s1545_s29  ;;  %18 = sbr.rel (!%p16_p10) target bundleno = 4 (0x4), region = 93 }
 0x1fe   :  { %825 = vsyncpa [#allocation5], 1 }
 0x1ff   :  { %827 = vsyncpa [#allocation5 + $0x1], 1 }

</bundles_post_ra>
